<compile_context>
chip_gen: v5e
topology: v5e:2x2
jax: 0.10.0
libtpu: 0.0.40
codegen_flags: <defaults>
</compile_context>

<pallas_src>
import functools

import jax
import jax.numpy as jnp
from jax import lax
from jax.experimental import pallas as pl
from jax.experimental.pallas import tpu as pltpu


# ------------------------------ Pallas kernel -------------------------------

def _make_basic_block_kernel(s, Ho, Wo, Cin, Cout):
    """Returns the fused BasicBlock kernel specialized to static shapes."""
    M = Ho * Wo

    def kernel(xpoly_ref, w1_ref, b1_ref, w2_ref, b2_ref, sproj_ref, o_ref, h1p_ref):
        # xpoly_ref : (1, s*s, Hps, Wps, Cin) f32  polyphase zero-padded input (one image)
        # w1_ref    : (9*Cin, Cout)  bf16          conv1 weights, BN1 scale folded, im2col layout
        # b1_ref    : (1, Cout)      f32           folded BN1 bias
        # w2_ref    : (9*Cout, Cout) bf16          conv2 weights, BN2 scale folded
        # b2_ref    : (1, Cout)      f32           folded BN2 bias
        # sproj_ref : (Cin, Cout)    bf16          shortcut channel-placement matrix
        # o_ref     : (1, Ho*Wo, Cout)             output block
        # h1p_ref   : (Ho+2, Wo+2, Cout) f32 VMEM  scratch: zero-padded conv1 activation
        xph = xpoly_ref[0]                         # (s*s, Hps, Wps, Cin)

        def conv1_tap(dy, dx):
            # A strided 3x3 tap is a *contiguous* static slice of one polyphase component.
            ph = (dy % s) * s + (dx % s)
            oy, ox = dy // s, dx // s
            return xph[ph, oy:oy + Ho, ox:ox + Wo, :].reshape(M, Cin)

        taps1 = [conv1_tap(dy, dx) for dy in range(3) for dx in range(3)]
        im2col1 = jnp.concatenate(taps1, axis=-1).astype(jnp.bfloat16)   # (M, 9*Cin)

        # conv1 + bn1 + relu : one MXU matmul (K = 9*Cin), f32 accumulation.
        h1 = jnp.dot(im2col1, w1_ref[...], preferred_element_type=jnp.float32)
        h1 = jnp.maximum(h1 + b1_ref[...], 0.0)                          # (M, Cout)

        # Zero-pad the conv1 activation in VMEM (halo for conv2) - never leaves VMEM.
        h1p_ref[...] = jnp.zeros(h1p_ref.shape, h1p_ref.dtype)
        h1p_ref[1:Ho + 1, 1:Wo + 1, :] = h1.reshape(Ho, Wo, Cout)
        h1p = h1p_ref[...]

        taps2 = [h1p[dy:dy + Ho, dx:dx + Wo, :].reshape(M, Cout)
                 for dy in range(3) for dx in range(3)]
        im2col2 = jnp.concatenate(taps2, axis=-1).astype(jnp.bfloat16)   # (M, 9*Cout)

        # conv2 + bn2 + shortcut + relu.  The shortcut (identity, or option-A
        # channel-padded ::2 subsample of x) is the centre tap of conv1's im2col
        # matrix pushed through a (Cin, Cout) placement matrix on the MXU.
        acc = jnp.dot(im2col2, w2_ref[...], preferred_element_type=jnp.float32)
        acc = acc + b2_ref[...]
        acc = acc + jnp.dot(taps1[4].astype(jnp.bfloat16), sproj_ref[...],
                            preferred_element_type=jnp.float32)
        o_ref[0] = jnp.maximum(acc, 0.0).astype(o_ref.dtype)

    return kernel


# ------------------------------ module glue ---------------------------------

def fold_bn(gamma, beta, mean, var, eps=1e-5):
    scale = gamma / jnp.sqrt(var + eps)
    return scale, beta - mean * scale


def _basic_block_forward_impl(x_nchw, p, in_planes, planes, stride, option):
    """Forward pass of BasicBlock.  Input/output are NCHW (PyTorch convention)."""
    N, Cin, H, W = x_nchw.shape
    assert Cin == in_planes
    Cout = planes
    s = stride
    Ho = (H + 2 - 3) // s + 1
    Wo = (W + 2 - 3) // s + 1
    M = Ho * Wo

    # --- parameter preprocessing (pure folding + layout, done once under jit) ---
    s1, b1 = fold_bn(p['bn1_gamma'], p['bn1_beta'], p['bn1_mean'], p['bn1_var'])
    s2, b2 = fold_bn(p['bn2_gamma'], p['bn2_beta'], p['bn2_mean'], p['bn2_var'])
    w1f = (p['w1'] * s1).reshape(9 * Cin, Cout).astype(jnp.bfloat16)     # BN1 scale folded
    w2f = (p['w2'] * s2).reshape(9 * Cout, Cout).astype(jnp.bfloat16)    # BN2 scale folded
    b1 = b1.reshape(1, Cout).astype(jnp.float32)
    b2 = b2.reshape(1, Cout).astype(jnp.float32)

    # Shortcut channel-placement matrix (applied to the centre tap of conv1's im2col).
    if stride != 1 or in_planes != planes:
        if option == 'A':
            pad = planes // 4
            assert 2 * pad + in_planes == planes, "option-A shortcut expects planes == 2*in_planes"
            sproj = jnp.pad(jnp.eye(in_planes, dtype=jnp.float32),
                            ((0, 0), (pad, planes - in_planes - pad)))
        else:
            # TODO(synk): option 'B' (1x1 conv + BN) shortcut not implemented.
            raise NotImplementedError("option 'B' shortcut not implemented")
    else:
        sproj = jnp.eye(in_planes, dtype=jnp.float32)
    sproj = sproj.astype(jnp.bfloat16)

    # --- input layout plumbing: zero-pad + polyphase split so every *strided*
    # conv1 tap becomes a static contiguous slice inside the kernel ---------------
    x = jnp.transpose(x_nchw, (0, 2, 3, 1))                  # NCHW -> NHWC (C in lanes)
    xp = jnp.pad(x, ((0, 0), (1, 1), (1, 1), (0, 0)))
    Hp, Wp = xp.shape[1], xp.shape[2]
    if Hp % s or Wp % s:                                     # round spatial dims up to the stride
        xp = jnp.pad(xp, ((0, 0), (0, (-Hp) % s), (0, (-Wp) % s), (0, 0)))
        Hp, Wp = xp.shape[1], xp.shape[2]
    Hps, Wps = Hp // s, Wp // s
    xpoly = xp.reshape(N, Hps, s, Wps, s, Cin).transpose(0, 2, 4, 1, 3, 5)
    xpoly = xpoly.reshape(N, s * s, Hps, Wps, Cin)

    kernel = _make_basic_block_kernel(s, Ho, Wo, Cin, Cout)
    out = pl.pallas_call(
        kernel,
        out_shape=jax.ShapeDtypeStruct((N, M, Cout), x_nchw.dtype),
        grid=(N,),                                           # >=2-way parallel axis: both v7x TCs busy
        in_specs=[
            pl.BlockSpec((1, s * s, Hps, Wps, Cin), lambda n: (n, 0, 0, 0, 0)),
            pl.BlockSpec((9 * Cin, Cout), lambda n: (0, 0)),
            pl.BlockSpec((1, Cout), lambda n: (0, 0)),
            pl.BlockSpec((9 * Cout, Cout), lambda n: (0, 0)),
            pl.BlockSpec((1, Cout), lambda n: (0, 0)),
            pl.BlockSpec((Cin, Cout), lambda n: (0, 0)),
        ],
        out_specs=pl.BlockSpec((1, M, Cout), lambda n: (n, 0, 0)),
        scratch_shapes=[pltpu.VMEM((Ho + 2, Wo + 2, Cout), jnp.float32)],
        compiler_params=pltpu.CompilerParams(dimension_semantics=("parallel",)),
    )(xpoly, w1f, b1, w2f, b2, sproj)

    out = out.reshape(N, Ho, Wo, Cout)
    return jnp.transpose(out, (0, 3, 1, 2))                  # NHWC -> NCHW


_basic_block_forward_jit = jax.jit(_basic_block_forward_impl, static_argnums=(2, 3, 4, 5))


def basic_block_forward(x_nchw, p, in_planes, planes, stride=1, option='A'):
    return _basic_block_forward_jit(x_nchw, p, in_planes, planes, stride, option)


# ---------------------------- pure-JAX reference ----------------------------

def ref_basic_block(x, p, in_planes, planes, stride=1):
    def conv(x, w_hwio, s):
        return lax.conv_general_dilated(
            x, w_hwio, (s, s), ((1, 1), (1, 1)),
            dimension_numbers=('NCHW', 'HWIO', 'NCHW'))

    def bn(x, g, b, m, v, eps=1e-5):
        sc = g / jnp.sqrt(v + eps)
        return x * sc[None, :, None, None] + (b - m * sc)[None, :, None, None]

    out = jax.nn.relu(bn(conv(x, p['w1'], stride),
                         p['bn1_gamma'], p['bn1_beta'], p['bn1_mean'], p['bn1_var']))
    out = bn(conv(out, p['w2'], 1),
             p['bn2_gamma'], p['bn2_beta'], p['bn2_mean'], p['bn2_var'])
    if stride != 1 or in_planes != planes:
        pad = planes // 4
        sc = jnp.pad(x[:, :, ::2, ::2], ((0, 0), (pad, pad), (0, 0), (0, 0)))
    else:
        sc = x
    return jax.nn.relu(out + sc)


# ---------------------------------- main -------------------------------------

if __name__ == "__main__":
    def make_params(key, cin, cout):
        ks = jax.random.split(key, 10)
        return {
            'w1':        jax.random.normal(ks[0], (3, 3, cin, cout), jnp.float32) * 0.1,
            'bn1_gamma': jax.random.uniform(ks[1], (cout,), jnp.float32, 0.5, 1.5),
            'bn1_beta':  jax.random.normal(ks[2], (cout,), jnp.float32) * 0.1,
            'bn1_mean':  jax.random.normal(ks[3], (cout,), jnp.float32) * 0.1,
            'bn1_var':   jax.random.uniform(ks[4], (cout,), jnp.float32, 0.5, 1.5),
            'w2':        jax.random.normal(ks[5], (3, 3, cout, cout), jnp.float32) * 0.1,
            'bn2_gamma': jax.random.uniform(ks[6], (cout,), jnp.float32, 0.5, 1.5),
            'bn2_beta':  jax.random.normal(ks[7], (cout,), jnp.float32) * 0.1,
            'bn2_mean':  jax.random.normal(ks[8], (cout,), jnp.float32) * 0.1,
            'bn2_var':   jax.random.uniform(ks[9], (cout,), jnp.float32, 0.5, 1.5),
        }

    key = jax.random.PRNGKey(0)
    k1, k2, k3, k4 = jax.random.split(key, 4)

    # 1) downsampling block: BasicBlock(in_planes=16, planes=32, stride=2, option='A')
    N, in_planes, planes, H, W, stride = 2, 16, 32, 8, 8, 2
    p = make_params(k1, in_planes, planes)
    x = jax.random.normal(k2, (N, in_planes, H, W), jnp.float32)          # NCHW
    out = jax.block_until_ready(
        basic_block_forward(x, p, in_planes, planes, stride=stride, option='A'))
    ref = jax.block_until_ready(
        ref_basic_block(x, p, in_planes, planes, stride=stride))
    assert out.shape == (N, planes, H // stride, W // stride), out.shape
    # tolerance accounts for bf16 MXU operands (per perf guidance); accumulation is f32
    assert jnp.allclose(out, ref, atol=3e-2, rtol=3e-2), float(jnp.max(jnp.abs(out - ref)))

    # 2) identity block: BasicBlock(in_planes=16, planes=16, stride=1)
    p2 = make_params(k3, 16, 16)
    x2 = jax.random.normal(k4, (N, 16, H, W), jnp.float32)
    out2 = jax.block_until_ready(basic_block_forward(x2, p2, 16, 16, stride=1))
    ref2 = jax.block_until_ready(ref_basic_block(x2, p2, 16, 16, stride=1))
    assert out2.shape == (N, 16, H, W), out2.shape
    assert jnp.allclose(out2, ref2, atol=3e-2, rtol=3e-2), float(jnp.max(jnp.abs(out2 - ref2)))

    print("KERNEL_OK")
</pallas_src>

<mosaic_0001>
module attributes {stable_mosaic.version = 11 : i64} {
  func.func @kernel(%arg0: i32, %arg1: memref<1x4x5x5x16xf32, #tpu.memory_space<vmem>>, %arg2: memref<144x32xbf16, #tpu.memory_space<vmem>>, %arg3: memref<1x32xf32, #tpu.memory_space<vmem>>, %arg4: memref<288x32xbf16, #tpu.memory_space<vmem>>, %arg5: memref<1x32xf32, #tpu.memory_space<vmem>>, %arg6: memref<16x32xbf16, #tpu.memory_space<vmem>>, %arg7: memref<1x16x32xf32, #tpu.memory_space<vmem>>, %arg8: memref<6x6x32xf32, #tpu.memory_space<vmem>>) attributes {dimension_semantics = [#tpu.dimension_semantics<parallel>], iteration_bounds = array<i64: 2>, scalar_prefetch = 0 : i64, scratch_operands = 1 : i64, tpu.core_type = #tpu.core_type<tc>, window_params = [{transform_indices = @transform_0, window_bounds = array<i64: 1, 4, 5, 5, 16>}, {pipeline_mode = #tpu.pipeline_mode<synchronous>, transform_indices = @transform_1, window_bounds = array<i64: 144, 32>}, {pipeline_mode = #tpu.pipeline_mode<synchronous>, transform_indices = @transform_2, window_bounds = array<i64: 1, 32>}, {pipeline_mode = #tpu.pipeline_mode<synchronous>, transform_indices = @transform_3, window_bounds = array<i64: 288, 32>}, {pipeline_mode = #tpu.pipeline_mode<synchronous>, transform_indices = @transform_4, window_bounds = array<i64: 1, 32>}, {pipeline_mode = #tpu.pipeline_mode<synchronous>, transform_indices = @transform_5, window_bounds = array<i64: 16, 32>}, {transform_indices = @transform_6, window_bounds = array<i64: 1, 16, 32>}]} {
    %c0 = arith.constant 0 : index
    %c0_0 = arith.constant 0 : index
    %c0_1 = arith.constant 0 : index
    %c0_2 = arith.constant 0 : index
    %c0_3 = arith.constant 0 : index
    %0 = vector.load %arg1[%c0, %c0_0, %c0_1, %c0_2, %c0_3] : memref<1x4x5x5x16xf32, #tpu.memory_space<vmem>>, vector<1x4x5x5x16xf32>
    %1 = vector.shape_cast %0 : vector<1x4x5x5x16xf32> to vector<4x5x5x16xf32>
    %2 = vector.extract_strided_slice %1 {offsets = [0, 0, 0, 0], sizes = [1, 4, 4, 16], strides = [1, 1, 1, 1]} : vector<4x5x5x16xf32> to vector<1x4x4x16xf32>
    %3 = vector.shape_cast %2 : vector<1x4x4x16xf32> to vector<4x4x16xf32>
    %4 = vector.shape_cast %3 : vector<4x4x16xf32> to vector<16x16xf32>
    %5 = vector.extract_strided_slice %1 {offsets = [1, 0, 0, 0], sizes = [1, 4, 4, 16], strides = [1, 1, 1, 1]} : vector<4x5x5x16xf32> to vector<1x4x4x16xf32>
    %6 = vector.shape_cast %5 : vector<1x4x4x16xf32> to vector<4x4x16xf32>
    %7 = vector.shape_cast %6 : vector<4x4x16xf32> to vector<16x16xf32>
    %8 = vector.extract_strided_slice %1 {offsets = [0, 0, 1, 0], sizes = [1, 4, 4, 16], strides = [1, 1, 1, 1]} : vector<4x5x5x16xf32> to vector<1x4x4x16xf32>
    %9 = vector.shape_cast %8 : vector<1x4x4x16xf32> to vector<4x4x16xf32>
    %10 = vector.shape_cast %9 : vector<4x4x16xf32> to vector<16x16xf32>
    %11 = vector.extract_strided_slice %1 {offsets = [2, 0, 0, 0], sizes = [1, 4, 4, 16], strides = [1, 1, 1, 1]} : vector<4x5x5x16xf32> to vector<1x4x4x16xf32>
    %12 = vector.shape_cast %11 : vector<1x4x4x16xf32> to vector<4x4x16xf32>
    %13 = vector.shape_cast %12 : vector<4x4x16xf32> to vector<16x16xf32>
    %14 = vector.extract_strided_slice %1 {offsets = [3, 0, 0, 0], sizes = [1, 4, 4, 16], strides = [1, 1, 1, 1]} : vector<4x5x5x16xf32> to vector<1x4x4x16xf32>
    %15 = vector.shape_cast %14 : vector<1x4x4x16xf32> to vector<4x4x16xf32>
    %16 = vector.shape_cast %15 : vector<4x4x16xf32> to vector<16x16xf32>
    %17 = vector.extract_strided_slice %1 {offsets = [2, 0, 1, 0], sizes = [1, 4, 4, 16], strides = [1, 1, 1, 1]} : vector<4x5x5x16xf32> to vector<1x4x4x16xf32>
    %18 = vector.shape_cast %17 : vector<1x4x4x16xf32> to vector<4x4x16xf32>
    %19 = vector.shape_cast %18 : vector<4x4x16xf32> to vector<16x16xf32>
    %20 = vector.extract_strided_slice %1 {offsets = [0, 1, 0, 0], sizes = [1, 4, 4, 16], strides = [1, 1, 1, 1]} : vector<4x5x5x16xf32> to vector<1x4x4x16xf32>
    %21 = vector.shape_cast %20 : vector<1x4x4x16xf32> to vector<4x4x16xf32>
    %22 = vector.shape_cast %21 : vector<4x4x16xf32> to vector<16x16xf32>
    %23 = vector.extract_strided_slice %1 {offsets = [1, 1, 0, 0], sizes = [1, 4, 4, 16], strides = [1, 1, 1, 1]} : vector<4x5x5x16xf32> to vector<1x4x4x16xf32>
    %24 = vector.shape_cast %23 : vector<1x4x4x16xf32> to vector<4x4x16xf32>
    %25 = vector.shape_cast %24 : vector<4x4x16xf32> to vector<16x16xf32>
    %26 = vector.extract_strided_slice %1 {offsets = [0, 1, 1, 0], sizes = [1, 4, 4, 16], strides = [1, 1, 1, 1]} : vector<4x5x5x16xf32> to vector<1x4x4x16xf32>
    %27 = vector.shape_cast %26 : vector<1x4x4x16xf32> to vector<4x4x16xf32>
    %28 = vector.shape_cast %27 : vector<4x4x16xf32> to vector<16x16xf32>
    %29 = tpu.concatenate %4, %7, %10, %13, %16, %19, %22, %25, %28 in 1 : vector<16x16xf32>, vector<16x16xf32>, vector<16x16xf32>, vector<16x16xf32>, vector<16x16xf32>, vector<16x16xf32>, vector<16x16xf32>, vector<16x16xf32>, vector<16x16xf32> -> vector<16x144xf32>
    %30 = arith.truncf %29 : vector<16x144xf32> to vector<16x144xbf16>
    %c0_4 = arith.constant 0 : index
    %c0_5 = arith.constant 0 : index
    %31 = vector.load %arg2[%c0_4, %c0_5] : memref<144x32xbf16, #tpu.memory_space<vmem>>, vector<144x32xbf16>
    %cst = arith.constant dense<0.000000e+00> : vector<16x32xf32>
    %32 = tpu.matmul %30, %31, %cst {dimension_numbers = #tpu.dot_dimension_numbers<[1], [0], [0], [1], [0, 0, 1, 1], [], []>} : vector<16x144xbf16>, vector<144x32xbf16>, vector<16x32xf32> -> vector<16x32xf32>
    %c0_6 = arith.constant 0 : index
    %c0_7 = arith.constant 0 : index
    %33 = vector.load %arg3[%c0_6, %c0_7] : memref<1x32xf32, #tpu.memory_space<vmem>>, vector<1x32xf32>
    %34 = vector.broadcast %33 : vector<1x32xf32> to vector<16x32xf32>
    %35 = arith.addf %32, %34 : vector<16x32xf32>
    %cst_8 = arith.constant 0.000000e+00 : f32
    %36 = vector.broadcast %cst_8 : f32 to vector<16x32xf32>
    %37 = arith.maximumf %35, %36 : vector<16x32xf32>
    %cst_9 = arith.constant 0.000000e+00 : f32
    %38 = vector.broadcast %cst_9 : f32 to vector<6x6x32xf32>
    %c0_10 = arith.constant 0 : index
    %c0_11 = arith.constant 0 : index
    %c0_12 = arith.constant 0 : index
    %39 = vector.load %arg8[%c0_10, %c0_11, %c0_12] : memref<6x6x32xf32, #tpu.memory_space<vmem>>, vector<6x6x32xf32>
    tpu.vector_store %arg8[%c0_10, %c0_11, %c0_12], %38 {strides = array<i32>} : memref<6x6x32xf32, #tpu.memory_space<vmem>>, vector<6x6x32xf32>,
    %40 = vector.shape_cast %37 : vector<16x32xf32> to vector<4x4x32xf32>
    %c1 = arith.constant 1 : index
    %c1_13 = arith.constant 1 : index
    %c0_14 = arith.constant 0 : index
    %41 = vector.load %arg8[%c1, %c1_13, %c0_14] : memref<6x6x32xf32, #tpu.memory_space<vmem>>, vector<4x4x32xf32>
    tpu.vector_store %arg8[%c1, %c1_13, %c0_14], %40 {strides = array<i32>} : memref<6x6x32xf32, #tpu.memory_space<vmem>>, vector<4x4x32xf32>,
    %c0_15 = arith.constant 0 : index
    %c0_16 = arith.constant 0 : index
    %c0_17 = arith.constant 0 : index
    %42 = vector.load %arg8[%c0_15, %c0_16, %c0_17] : memref<6x6x32xf32, #tpu.memory_space<vmem>>, vector<6x6x32xf32>
    %43 = vector.extract_strided_slice %42 {offsets = [0, 0, 0], sizes = [4, 4, 32], strides = [1, 1, 1]} : vector<6x6x32xf32> to vector<4x4x32xf32>
    %44 = vector.shape_cast %43 : vector<4x4x32xf32> to vector<16x32xf32>
    %45 = vector.extract_strided_slice %42 {offsets = [0, 1, 0], sizes = [4, 4, 32], strides = [1, 1, 1]} : vector<6x6x32xf32> to vector<4x4x32xf32>
    %46 = vector.shape_cast %45 : vector<4x4x32xf32> to vector<16x32xf32>
    %47 = vector.extract_strided_slice %42 {offsets = [0, 2, 0], sizes = [4, 4, 32], strides = [1, 1, 1]} : vector<6x6x32xf32> to vector<4x4x32xf32>
    %48 = vector.shape_cast %47 : vector<4x4x32xf32> to vector<16x32xf32>
    %49 = vector.extract_strided_slice %42 {offsets = [1, 0, 0], sizes = [4, 4, 32], strides = [1, 1, 1]} : vector<6x6x32xf32> to vector<4x4x32xf32>
    %50 = vector.shape_cast %49 : vector<4x4x32xf32> to vector<16x32xf32>
    %51 = vector.extract_strided_slice %42 {offsets = [1, 1, 0], sizes = [4, 4, 32], strides = [1, 1, 1]} : vector<6x6x32xf32> to vector<4x4x32xf32>
    %52 = vector.shape_cast %51 : vector<4x4x32xf32> to vector<16x32xf32>
    %53 = vector.extract_strided_slice %42 {offsets = [1, 2, 0], sizes = [4, 4, 32], strides = [1, 1, 1]} : vector<6x6x32xf32> to vector<4x4x32xf32>
    %54 = vector.shape_cast %53 : vector<4x4x32xf32> to vector<16x32xf32>
    %55 = vector.extract_strided_slice %42 {offsets = [2, 0, 0], sizes = [4, 4, 32], strides = [1, 1, 1]} : vector<6x6x32xf32> to vector<4x4x32xf32>
    %56 = vector.shape_cast %55 : vector<4x4x32xf32> to vector<16x32xf32>
    %57 = vector.extract_strided_slice %42 {offsets = [2, 1, 0], sizes = [4, 4, 32], strides = [1, 1, 1]} : vector<6x6x32xf32> to vector<4x4x32xf32>
    %58 = vector.shape_cast %57 : vector<4x4x32xf32> to vector<16x32xf32>
    %59 = vector.extract_strided_slice %42 {offsets = [2, 2, 0], sizes = [4, 4, 32], strides = [1, 1, 1]} : vector<6x6x32xf32> to vector<4x4x32xf32>
    %60 = vector.shape_cast %59 : vector<4x4x32xf32> to vector<16x32xf32>
    %61 = tpu.concatenate %44, %46, %48, %50, %52, %54, %56, %58, %60 in 1 : vector<16x32xf32>, vector<16x32xf32>, vector<16x32xf32>, vector<16x32xf32>, vector<16x32xf32>, vector<16x32xf32>, vector<16x32xf32>, vector<16x32xf32>, vector<16x32xf32> -> vector<16x288xf32>
    %62 = arith.truncf %61 : vector<16x288xf32> to vector<16x288xbf16>
    %c0_18 = arith.constant 0 : index
    %c0_19 = arith.constant 0 : index
    %63 = vector.load %arg4[%c0_18, %c0_19] : memref<288x32xbf16, #tpu.memory_space<vmem>>, vector<288x32xbf16>
    %cst_20 = arith.constant dense<0.000000e+00> : vector<16x32xf32>
    %64 = tpu.matmul %62, %63, %cst_20 {dimension_numbers = #tpu.dot_dimension_numbers<[1], [0], [0], [1], [0, 0, 1, 1], [], []>} : vector<16x288xbf16>, vector<288x32xbf16>, vector<16x32xf32> -> vector<16x32xf32>
    %c0_21 = arith.constant 0 : index
    %c0_22 = arith.constant 0 : index
    %65 = vector.load %arg5[%c0_21, %c0_22] : memref<1x32xf32, #tpu.memory_space<vmem>>, vector<1x32xf32>
    %66 = vector.broadcast %65 : vector<1x32xf32> to vector<16x32xf32>
    %67 = arith.addf %64, %66 : vector<16x32xf32>
    %68 = arith.truncf %16 : vector<16x16xf32> to vector<16x16xbf16>
    %c0_23 = arith.constant 0 : index
    %c0_24 = arith.constant 0 : index
    %69 = vector.load %arg6[%c0_23, %c0_24] : memref<16x32xbf16, #tpu.memory_space<vmem>>, vector<16x32xbf16>
    %cst_25 = arith.constant dense<0.000000e+00> : vector<16x32xf32>
    %70 = tpu.matmul %68, %69, %cst_25 {dimension_numbers = #tpu.dot_dimension_numbers<[1], [0], [0], [1], [0, 0, 1, 1], [], []>} : vector<16x16xbf16>, vector<16x32xbf16>, vector<16x32xf32> -> vector<16x32xf32>
    %71 = arith.addf %67, %70 : vector<16x32xf32>
    %cst_26 = arith.constant 0.000000e+00 : f32
    %72 = vector.broadcast %cst_26 : f32 to vector<16x32xf32>
    %73 = arith.maximumf %71, %72 : vector<16x32xf32>
    %c0_27 = arith.constant 0 : index
    %c0_28 = arith.constant 0 : index
    %c0_29 = arith.constant 0 : index
    %74 = vector.load %arg7[%c0_27, %c0_28, %c0_29] : memref<1x16x32xf32, #tpu.memory_space<vmem>>, vector<1x16x32xf32>
    %75 = vector.shape_cast %74 : vector<1x16x32xf32> to vector<16x32xf32>
    %76 = vector.shape_cast %73 : vector<16x32xf32> to vector<1x16x32xf32>
    tpu.vector_store %arg7[%c0_27, %c0_28, %c0_29], %76 {strides = array<i32>} : memref<1x16x32xf32, #tpu.memory_space<vmem>>, vector<1x16x32xf32>,
    return
  }
  func.func @transform_0(%arg0: i32) -> (i32, i32, i32, i32, i32) {
    %c0_i32 = arith.constant 0 : i32
    %c0_i32_0 = arith.constant 0 : i32
    %c0_i32_1 = arith.constant 0 : i32
    %c0_i32_2 = arith.constant 0 : i32
    %c0_i32_3 = arith.constant 0 : i32
    return %arg0, %c0_i32, %c0_i32_0, %c0_i32_1, %c0_i32_2 : i32, i32, i32, i32, i32
  }
  func.func @transform_1(%arg0: i32) -> (i32, i32) {
    %c0_i32 = arith.constant 0 : i32
    %c0_i32_0 = arith.constant 0 : i32
    %c0_i32_1 = arith.constant 0 : i32
    return %c0_i32, %c0_i32_0 : i32, i32
  }
  func.func @transform_2(%arg0: i32) -> (i32, i32) {
    %c0_i32 = arith.constant 0 : i32
    %c0_i32_0 = arith.constant 0 : i32
    %c0_i32_1 = arith.constant 0 : i32
    return %c0_i32, %c0_i32_0 : i32, i32
  }
  func.func @transform_3(%arg0: i32) -> (i32, i32) {
    %c0_i32 = arith.constant 0 : i32
    %c0_i32_0 = arith.constant 0 : i32
    %c0_i32_1 = arith.constant 0 : i32
    return %c0_i32, %c0_i32_0 : i32, i32
  }
  func.func @transform_4(%arg0: i32) -> (i32, i32) {
    %c0_i32 = arith.constant 0 : i32
    %c0_i32_0 = arith.constant 0 : i32
    %c0_i32_1 = arith.constant 0 : i32
    return %c0_i32, %c0_i32_0 : i32, i32
  }
  func.func @transform_5(%arg0: i32) -> (i32, i32) {
    %c0_i32 = arith.constant 0 : i32
    %c0_i32_0 = arith.constant 0 : i32
    %c0_i32_1 = arith.constant 0 : i32
    return %c0_i32, %c0_i32_0 : i32, i32
  }
  func.func @transform_6(%arg0: i32) -> (i32, i32, i32) {
    %c0_i32 = arith.constant 0 : i32
    %c0_i32_0 = arith.constant 0 : i32
    %c0_i32_1 = arith.constant 0 : i32
    return %arg0, %c0_i32, %c0_i32_0 : i32, i32, i32
  }
}

</mosaic_0001>

<bundles_post_ra>
// kernel: _basic_block_forward_impl.1
= control target key start
LH: loop header
LB: loop body
LE: loop exit
PB: predicated region body
PF: predicated region fallthrough
CT: control target
= control target key end

     0   :  { %11 = vsyncpa [#allocation4], 0  ;;  %s1909_s0 = inlined_call_operand.vmem [shape: f32[2,4,5,5,16], index: 0, kind: input, shape index: {}]   ;;  %s1910_s1 = inlined_call_operand.vmem [shape: bf16[144,32], index: 1, kind: input, shape index: {}]   ;;  %s1911_s2 = inlined_call_operand.vmem [shape: f32[1,32], index: 2, kind: input, shape index: {}]   ;;  %s1912_s3 = inlined_call_operand.vmem [shape: bf16[288,32], index: 3, kind: input, shape index: {}]   ;;  %s1913_s4 = inlined_call_operand.vmem [shape: f32[1,32], index: 4, kind: input, shape index: {}]   ;;  %s1914_s5 = inlined_call_operand.vmem [shape: bf16[16,32], index: 5, kind: input, shape index: {}]   ;;  %s1915_s6 = inlined_call_operand.hbm [shape: f32[2,16,32], index: 6, kind: output, shape index: {}]  }
   0x1   :  { %13 = vsyncpa [#allocation4 + $0x1], 0  ;;  %s1545_s21 = smov 0   ;;  %s1547_s22 = smov 0  }
   0x2   :  { %s1549_s23 = smov 0   ;;  %s1551_s24 = smov 0  }
   0x3 LB: > { %s1566_s25 = sadd.s32 4294967295, %s1498_s24   ;;  %s1134_s26 = sadd.s32 4294967294, %s1498_s24   ;;  %s1498_s24 = sphi %s1551_s24, %s1925_s24   ;;  %s1494_s23 = sphi %s1549_s23, %s1924_s23   ;;  %s1490_s22 = sphi %s1547_s22, %s1923_s22   ;;  %s1486_s21 = sphi %s1545_s21, %s1922_s21  }
   0x4   : > { %s1570_s27 = sadd.s32 1, %s1498_s24   ;;  %s157_s28 = sadd.s32 1, %s1494_s23 }
   0x5   : > { %s154_s29 = ssub.s32 %s1498_s24, %s1570_s27  ;;  %p167_p0 = scmp.ne.s32.totalorder %s1494_s23, %s1490_s22 }
   0x6   : > { %p155_p1 = scmp.eq.s32.totalorder %s154_s29, 0  ;;  %p168_p2 = scmp.eq.s32.totalorder %s1566_s25, 1 }
   0x7   : > { %p173_p3 = scmp.ne.s32.totalorder %s1490_s22, %s1486_s21  ;;  %p174_p4 = scmp.eq.s32.totalorder %s1134_s26, 1 }
   0x8   : > { %s1581_s30 = scalar_select %p155_p1, %s1494_s23, %s157_s28  }
   0x9   : > { %p1583_p5 = por %p168_p2, %p167_p0  ;;  %p1587_p6 = por %p174_p4, %p173_p3 }
   0xa   : > { %p1137_p7 = scmp.ge.s32.totalorder %s1498_s24, 1  ;;  %p215_p8 = scmp.lt.s32.totalorder %s1498_s24, 3 }
   0xc   : > { %p216_p9 = pnand %p1137_p7, %p215_p8 }
   0xd   : > { %p245_p10 = scmp.lt.s32.totalorder (!%p216_p9), %s1566_s25, 1  ;;  %s1500_s14 = smov (!%p216_p9), 16  }
   0xe   : > { %219 = sbr.rel (%p216_p9) target bundleno = 716 (0x2cc), region = 44  ;;  %s1501_s15 = smov (!%p216_p9), 32  }
   0xf   : > { %s1502_s16 = smov (!%p216_p9), 48   ;;  %s1503_s19 = smov (!%p216_p9), 64  }
  0x10   : > { %s1504_s20 = smov (!%p216_p9), 80   ;;  %s1505_s26 = smov (!%p216_p9), 96  }
  0x11   : > { %s1506_s28 = smov (!%p216_p9), 112   ;;  %s1318_s11 = sshll.u32 (!%p216_p9), %s1566_s25, 4 }
  0x13   : > { %s246_s9 = scalar_select %p245_p10, %s1566_s25, 1  ;;  %v1297_v36 = vld [vmem:[%s1910_s1 + $0x38] sm:$0xff]  ;;  %v1296_v50 = vld [vmem:[%s1910_s1 + $0x30] sm:$0xff]  ;;  %v1295_v51 = vld [vmem:[%s1910_s1 + $0x28] sm:$0xff]  ;;  %vm462_vm0 = vcmask 130048   ;;  %vm465_vm1 = vcmask 261120  }
  0x14   : > { %564 = vmatpush.bf16.msra.mxu0 %v1297_v36  ;;  %v1294_v52 = vld [vmem:[%s1910_s1 + $0x20] sm:$0xff]  ;;  %v1293_v53 = vld [vmem:[%s1910_s1 + $0x18] sm:$0xff]  ;;  %v1292_v55 = vld [vmem:[%s1910_s1 + $0x10] sm:$0xff]  ;;  %vm468_vm2 = vcmask 392192   ;;  %vm471_vm3 = vcmask 523264   ;;  %vm474_vm4 = vcmask 654336  }
  0x15   : > { %s1319_s10 = smul.u32 160, %s246_s9  ;;  %v1298_v54 = vld [vmem:[%s1910_s1 + $0x40] sm:$0xff]  ;;  %v1291_v56 = vld [vmem:[%s1910_s1 + $0x8] sm:$0xff]  ;;  %vm477_vm5 = vcmask 785408   ;;  %vm480_vm6 = vcmask 916480   ;;  %vm594_vm7 = vcmask 259072  }
  0x16   : > { %585 = vmatpush.bf16.msra.mxu1 %v1298_v54  ;;  %v1290_v61 = vld [vmem:[%s1910_s1] sm:$0xff]  ;;  %vm608_vm8 = vcmask 257024   ;;  %vm277_vm9 = vcmask 1042432   ;;  %vm278_vm10 = vcmask 1046532   ;;  %vm643_vm12 = vcmask 1041408   ;;  %s242_s9 = sand.u32 1, %s1490_s22  }
  0x17   : > { %s1598_s13 = scalar_lea.vmem %s1909_s0, %s1319_s10  ;;  %vm1724_vm11 = vmor %vm277_vm9, %vm278_vm10  ;;  %vm644_vm13 = vcmask 1045508   ;;  %s1138_s10 = sshll.u32 %s242_s9, 4 }
  0x18   : > { %v251_v0 = vld [vmem:[%s1598_s13] sm:$0x1f]  ;;  %v1602_v1 = vld [vmem:[%s1598_s13 + $0x8] sm:$0x1f]  ;;  %v1605_v2 = vld [vmem:[%s1598_s13 + $0x10] sm:$0x1f]  ;;  %565 = vmatpush.bf16.msra.mxu0 %v1296_v50 }
  0x19   : > { %v1608_v3 = vld [vmem:[%s1598_s13 + $0x18] sm:$0x1f]  ;;  %326 = vst [vmem:[#allocation1] ss:$2 sm:$0xff] %v251_v0  ;;  %v256_v4 = vld [vmem:[%s1598_s13 + $0x28] sm:$0x1f]  ;;  %vm1739_vm14 = vmor %vm643_vm12, %vm644_vm13 }
  0x1a   : > { %328 = vst [vmem:[#allocation1 + $0x1] ss:$2 sm:$0xff] %v1602_v1  ;;  %v1615_v5 = vld [vmem:[%s1598_s13 + $0x30] sm:$0x1f]  ;;  %v1618_v6 = vld [vmem:[%s1598_s13 + $0x38] sm:$0x1f] }
  0x1b   : > { %330 = vst [vmem:[#allocation1 + $0x10] ss:$2 sm:$0xff] %v1605_v2  ;;  %v1623_v8 = vld [vmem:[%s1598_s13 + $0x40] sm:$0x1f]  ;;  %v1140_v10 = vrot.slane %v251_v0, 9  ;;  %v1142_v11 = vrot.slane %v1602_v1, 9 }
  0x1c   : > { %332 = vst [vmem:[#allocation1 + $0x11] ss:$2 sm:$0xff] %v1608_v3  ;;  %v1144_v12 = vrot.slane %v1605_v2, 9  ;;  %v1146_v14 = vrot.slane %v1608_v3, 9  ;;  %v261_v17 = vld [vmem:[%s1598_s13 + $0x50] sm:$0x1f]  ;;  %566 = vmatpush.bf16.msra.mxu0 %v1295_v51 }
  0x1d   : > { %v262_v18 = vld [vmem:[%s1598_s13 + $0x58] sm:$0x1f]  ;;  %v263_v19 = vld [vmem:[%s1598_s13 + $0x60] sm:$0x1f]  ;;  %v264_v21 = vld [vmem:[%s1598_s13 + $0x68] sm:$0x1f] }
  0x1e   : > { %v1645_v24 = vld [vmem:[%s1598_s13 + $0x78] sm:$0x1f]  ;;  %v1648_v25 = vld [vmem:[%s1598_s13 + $0x80] sm:$0x1f]  ;;  %v1651_v27 = vld [vmem:[%s1598_s13 + $0x88] sm:$0x1f] }
  0x1f   : > { %v1654_v28 = vld [vmem:[%s1598_s13 + $0x90] sm:$0x1f]  ;;  %v1148_v31 = vrot.slane %v261_v17, 9  ;;  %v1150_v32 = vrot.slane %v262_v18, 9  ;;  %v1152_v33 = vrot.slane %v263_v19, 9  ;;  %v1154_v35 = vrot.slane %v264_v21, 9 }
  0x20   : > { %v255_v40 = vld [vmem:[%s1598_s13 + $0x20] sm:$0x1f]  ;;  %v260_v44 = vld [vmem:[%s1598_s13 + $0x48] sm:$0x1f]  ;;  %567 = vmatpush.bf16.msra.mxu0 %v1294_v52  ;;  %s1057_s25 = scalar_lea.sflag [#allocation4], %s242_s9 }
  0x21   : > { %v1620_v7 = vld.sshfl [vmem:[#allocation1] sm:$0xff pattern:$0x75316420]  ;;  %v1156_v57 = vrot.slane %v255_v40, 9 }
  0x22   : > { %341 = vst [vmem:[#allocation1] ss:$2 sm:$0xff] %v256_v4 }
  0x23   : > { %v1625_v9 = vld.sshfl [vmem:[#allocation1 + $0x10] sm:$0xff pattern:$0x75316420]  ;;  %343 = vst [vmem:[#allocation1 + $0x1] ss:$2 sm:$0xff] %v1615_v5 }
  0x24   : > { %345 = vst [vmem:[#allocation1 + $0x10] ss:$2 sm:$0xff] %v1618_v6  ;;  %568 = vmatpush.bf16.msra.mxu0 %v1293_v53 }
  0x25   : > { %347 = vst [vmem:[#allocation1 + $0x11] ss:$2 sm:$0xff] %v1623_v8 }
  0x28   : > { %569 = vmatpush.bf16.msra.mxu0 %v1292_v55 }
  0x2a   : > { %v348_v13 = vld.sshfl [vmem:[#allocation1] sm:$0xff pattern:$0x75316420] }
  0x2b   : > { %356 = vst [vmem:[#allocation1] ss:$2 sm:$0xff] %v1140_v10 }
  0x2c   : > { %v349_v15 = vld.sshfl [vmem:[#allocation1 + $0x10] sm:$0xff pattern:$0x75316420]  ;;  %358 = vst [vmem:[#allocation1 + $0x1] ss:$2 sm:$0xff] %v1142_v11  ;;  %570 = vmatpush.bf16.msra.mxu0 %v1291_v56 }
  0x2d   : > { %v1369_v16 = vpack.i.bf16 %v349_v15, %v348_v13  ;;  %360 = vst [vmem:[#allocation1 + $0x10] ss:$2 sm:$0xff] %v1144_v12 }
  0x2e   : > { %362 = vst [vmem:[#allocation1 + $0x11] ss:$2 sm:$0xff] %v1146_v14 }
  0x2f   : > { %1370 = vrot.lane.b32.xlu0 %v1369_v16, %s1500_s14  ;;  %s1068_s14 = scalar_lea.hbm %s1915_s6, %s1318_s11 }
  0x30   : > { %571 = vmatpush.bf16.msra.mxu0 %v1290_v61  ;;  %s1071_s18 = sshll.u32 %s1068_s14, 4  ;;  %s1072_s18 = int_to_ptr.hbm [resolvable:$true] %s1071_s18 }
  0x33   : > { %v363_v20 = vld.sshfl [vmem:[#allocation1] sm:$0xff pattern:$0x75316420] }
  0x34   : > { %371 = vst [vmem:[#allocation1] ss:$2 sm:$0xff] %v261_v17 }
  0x35   : > { %v364_v22 = vld.sshfl [vmem:[#allocation1 + $0x10] sm:$0xff pattern:$0x75316420]  ;;  %373 = vst [vmem:[#allocation1 + $0x1] ss:$2 sm:$0xff] %v262_v18 }
  0x36   : > { %375 = vst [vmem:[#allocation1 + $0x10] ss:$2 sm:$0xff] %v263_v19  ;;  %v1374_v23 = vpack.i.bf16 %v364_v22, %v363_v20 }
  0x37   : > { %377 = vst [vmem:[#allocation1 + $0x11] ss:$2 sm:$0xff] %v264_v21 }
  0x38   : > { %1375 = vrot.lane.b32.xlu0 %v1374_v23, %s1501_s15 }
  0x3c   : > { %v378_v26 = vld.sshfl [vmem:[#allocation1] sm:$0xff pattern:$0x75316420] }
  0x3d   : > { %390 = vst [vmem:[#allocation1] ss:$2 sm:$0xff] %v1645_v24 }
  0x3e   : > { %v379_v29 = vld.sshfl [vmem:[#allocation1 + $0x10] sm:$0xff pattern:$0x75316420]  ;;  %392 = vst [vmem:[#allocation1 + $0x1] ss:$2 sm:$0xff] %v1648_v25 }
  0x3f   : > { %v1379_v30 = vpack.i.bf16 %v379_v29, %v378_v26  ;;  %394 = vst [vmem:[#allocation1 + $0x10] ss:$2 sm:$0xff] %v1651_v27 }
  0x40   : > { %396 = vst [vmem:[#allocation1 + $0x11] ss:$2 sm:$0xff] %v1654_v28 }
  0x41   : > { %1380 = vrot.lane.b32.xlu1 %v1379_v30, %s1502_s16  ;;  %s244_s16 = scalar_lea.vmem [#allocation3], %s1138_s10 }
  0x42   : > { %s1069_s17 = sshll.u32 %s244_s16, 4  ;;  %s1070_s17 = int_to_ptr.vmem [resolvable:$true] %s1069_s17 }
  0x45   : > { %v397_v34 = vld.sshfl [vmem:[#allocation1] sm:$0xff pattern:$0x75316420] }
  0x46   : > { %405 = vst [vmem:[#allocation1] ss:$2 sm:$0xff] %v1148_v31 }
  0x47   : > { %v398_v37 = vld.sshfl [vmem:[#allocation1 + $0x10] sm:$0xff pattern:$0x75316420]  ;;  %407 = vst [vmem:[#allocation1 + $0x1] ss:$2 sm:$0xff] %v1150_v32 }
  0x48   : > { %v1384_v38 = vpack.i.bf16 %v398_v37, %v397_v34  ;;  %409 = vst [vmem:[#allocation1 + $0x10] ss:$2 sm:$0xff] %v1152_v33 }
  0x49   : > { %411 = vst [vmem:[#allocation1 + $0x11] ss:$2 sm:$0xff] %v1154_v35 }
  0x4a   : > { %1385 = vrot.lane.b32.xlu1 %v1384_v38, %s1503_s19  ;;  %v1507_v38 = vmov 0.0  }
  0x4b   : > { %595 = vst.msk [vmem:[#allocation2] sm:$0x3f] %vm594_vm7, %v1507_v38 }
  0x4c   : > { %596 = vst.msk [vmem:[#allocation2 + $0x8] sm:$0x3f] %vm594_vm7, %v1507_v38 }
  0x4d   : > { %597 = vst.msk [vmem:[#allocation2 + $0x10] sm:$0x3f] %vm594_vm7, %v1507_v38 }
  0x4e   : > { %v412_v39 = vld.sshfl [vmem:[#allocation1] sm:$0xff pattern:$0x75316420]  ;;  %600 = vst.msk [vmem:[#allocation2 + $0x28] sm:$0x3f] %vm594_vm7, %v1507_v38 }
  0x4f   : > { %420 = vst [vmem:[#allocation1] ss:$2 sm:$0xff] %v1602_v1 }
  0x50   : > { %v413_v41 = vld.sshfl [vmem:[#allocation1 + $0x10] sm:$0xff pattern:$0x75316420]  ;;  %422 = vst [vmem:[#allocation1 + $0x1] ss:$2 sm:$0xff] %v1605_v2 }
  0x51   : > { %424 = vst [vmem:[#allocation1 + $0x10] ss:$2 sm:$0xff] %v1608_v3  ;;  %v1389_v42 = vpack.i.bf16 %v413_v41, %v412_v39 }
  0x52   : > { %426 = vst [vmem:[#allocation1 + $0x11] ss:$2 sm:$0xff] %v255_v40  ;;  %v613_v39 = vld [vmem:[#allocation2] sm:$0x3f]  ;;  %v1434_v40 = vld [vmem:[%s1911_s2] ss:$0 sm:$0xff] }
  0x53   : > { %1390 = vrot.lane.b32.xlu2 %v1389_v42, %s1504_s20  ;;  %598 = vst.msk [vmem:[#allocation2 + $0x18] sm:$0x3f] %vm594_vm7, %v1507_v38  ;;  %v623_v51 = vrot.slane %v613_v39, 4 }
  0x54   : > { %599 = vst.msk [vmem:[#allocation2 + $0x20] sm:$0x3f] %vm594_vm7, %v1507_v38 }
  0x57   : > { %v427_v43 = vld.sshfl [vmem:[#allocation1] sm:$0xff pattern:$0x75316420] }
  0x58   : > { %436 = vst [vmem:[#allocation1] ss:$2 sm:$0xff] %v1615_v5 }
  0x59   : > { %v428_v45 = vld.sshfl [vmem:[#allocation1 + $0x10] sm:$0xff pattern:$0x75316420]  ;;  %438 = vst [vmem:[#allocation1 + $0x1] ss:$2 sm:$0xff] %v1618_v6 }
  0x5a   : > { %440 = vst [vmem:[#allocation1 + $0x10] ss:$2 sm:$0xff] %v1623_v8  ;;  %v1394_v46 = vpack.i.bf16 %v428_v45, %v427_v43 }
  0x5b   : > { %442 = vst [vmem:[#allocation1 + $0x11] ss:$2 sm:$0xff] %v260_v44 }
  0x5c   : > { %1395 = vrot.lane.b32.xlu2 %v1394_v46, %s1505_s26 }
  0x60   : > { %v443_v47 = vld.sshfl [vmem:[#allocation1] sm:$0xff pattern:$0x75316420] }
  0x61   : > { %451 = vst [vmem:[#allocation1] ss:$2 sm:$0xff] %v1142_v11 }
  0x62   : > { %v444_v48 = vld.sshfl [vmem:[#allocation1 + $0x10] sm:$0xff pattern:$0x75316420]  ;;  %453 = vst [vmem:[#allocation1 + $0x1] ss:$2 sm:$0xff] %v1144_v12 }
  0x63   : > { %v1399_v49 = vpack.i.bf16 %v444_v48, %v443_v47  ;;  %455 = vst [vmem:[#allocation1 + $0x10] ss:$2 sm:$0xff] %v1146_v14 }
  0x64   : > { %457 = vst [vmem:[#allocation1 + $0x11] ss:$2 sm:$0xff] %v1156_v57  ;;  %v1195_v57 = vrot.slane %v613_v39, 9 }
  0x65   : > { %1400 = vrot.lane.b32.xlu0 %v1399_v49, %s1506_s28 }
  0x69   : > { %v458_v58 = vld.sshfl [vmem:[#allocation1] sm:$0xff pattern:$0x75316420] }
  0x6a   : > { %682 = vst [vmem:[#allocation1] ss:$2 sm:$0xff] %v613_v39 }
  0x6b   : > { %v459_v59 = vld.sshfl [vmem:[#allocation1 + $0x10] sm:$0xff pattern:$0x75316420] }
  0x6c   : > { %v484_v60 = vpack.c.bf16 %v459_v59, %v458_v58  ;;  %v629_v58 = vrot.slane %v623_v51, 5 }
  0x6e   : > { %1194 = vmatmul.msk.bf16.vlgmr.msra.gmra.mxu1 %vm462_vm0, %v484_v60  ;;  %v630_v61 = vsel %vm1724_vm11, %v1195_v57, %v629_v58 }
  0xa1   : > { %v1371_v62 = vpop.permute.xlu0 %1370 }
  0xa2   : > { %v1373_v0 = vunpack.i.h.bf16 %v1371_v62  ;;  %v1372_v1 = vunpack.i.l.bf16 %v1371_v62 }
  0xa4   : > { %v463_v6 = vsel %vm462_vm0, %v1620_v7, %v1372_v1  ;;  %v464_v8 = vsel %vm462_vm0, %v1625_v9, %v1373_v0 }
  0xaa   : > { %v1376_v2 = vpop.permute.xlu0 %1375 }
  0xab   : > { %v1378_v4 = vunpack.i.h.bf16 %v1376_v2  ;;  %v1377_v5 = vunpack.i.l.bf16 %v1376_v2 }
  0xad   : > { %v1391_v3 = vpop.permute.xlu2 %1390  ;;  %v466_v13 = vsel %vm465_vm1, %v463_v6, %v1377_v5  ;;  %v467_v14 = vsel %vm465_vm1, %v464_v8, %v1378_v4  ;;  %v1199_v4 = vrot.slane %v613_v39, 10  ;;  %v648_v5 = vrot.slane %v623_v51, 6  ;;  %v1306_v6 = vld [vmem:[%s1912_s3 + $0x38] sm:$0xff] }
  0xae   : > { %v1393_v19 = vunpack.i.h.bf16 %v1391_v3  ;;  %v1392_v20 = vunpack.i.l.bf16 %v1391_v3  ;;  %971 = vmatpush.bf16.msra.mxu2 %v1306_v6 }
  0xb3   : > { %v1381_v63 = vpop.permute.xlu1 %1380 }
  0xb4   : > { %v1383_v10 = vunpack.i.h.bf16 %v1381_v63  ;;  %v1382_v11 = vunpack.i.l.bf16 %v1381_v63 }
  0xb6   : > { %v469_v17 = vsel %vm468_vm2, %v466_v13, %v1382_v11  ;;  %v470_v18 = vsel %vm468_vm2, %v467_v14, %v1383_v10  ;;  %v1396_v7 = vpop.permute.xlu2 %1395  ;;  %v649_v11 = vsel %vm1739_vm14, %v1199_v4, %v648_v5 }
  0xb7   : > { %v1398_v22 = vunpack.i.h.bf16 %v1396_v7  ;;  %v1397_v23 = vunpack.i.l.bf16 %v1396_v7 }
  0xbc   : > { %v1386_v12 = vpop.permute.xlu1 %1385 }
  0xbd   : > { %v1388_v15 = vunpack.i.h.bf16 %v1386_v12  ;;  %v1387_v16 = vunpack.i.l.bf16 %v1386_v12 }
  0xbf   : > { %v472_v21 = vsel %vm471_vm3, %v469_v17, %v1387_v16  ;;  %v473_v9 = vsel %vm471_vm3, %v470_v18, %v1388_v15 }
  0xc0   : > { %v475_v26 = vsel %vm474_vm4, %v472_v21, %v1392_v20  ;;  %v476_v29 = vsel %vm474_vm4, %v473_v9, %v1393_v19 }
  0xc1   : > { %v478_v33 = vsel %vm477_vm5, %v475_v26, %v1397_v23  ;;  %v479_v34 = vsel %vm477_vm5, %v476_v29, %v1398_v22 }
  0xd7   : > { %v1401_v30 = vpop.permute.xlu0 %1400 }
  0xd8   : > { %v1403_v31 = vunpack.i.h.bf16 %v1401_v30  ;;  %v1402_v32 = vunpack.i.l.bf16 %v1401_v30 }
  0xda   : > { %v481_v35 = vsel %vm480_vm6, %v478_v33, %v1402_v32  ;;  %v482_v36 = vsel %vm480_vm6, %v479_v34, %v1403_v31 }
  0xdb   : > { %v483_v37 = vpack.c.bf16 %v482_v36, %v481_v35 }
  0xdd   : > { %572 = vmatmul.bf16.vlgmr.msra.gmra.mxu0 %v483_v37 }
  0xeb   : > { %v587_v41 = vpop.f32.mrf.mxu1 }
  0xf3   : > { %v589_v49 = vpop.f32.mrf.mxu1 }
 0x15a   : > { %v573_v42 = vpop.f32.mrf.mxu0 }
 0x15b   : > { %v574_v43 = vadd.f32 %v1434_v40, %v573_v42 }
 0x15d   : > { %v588_v44 = vadd.f32 %v587_v41, %v574_v43 }
 0x15f   : > { %v592_v45 = vmax.f32 %v588_v44, 0.0  ;;  %v1316_v44 = vld [vmem:[%s1912_s3 + $0x88] sm:$0xff] }
 0x160   : > { %1005 = vmatpush.bf16.msrb.mxu1 %v1316_v44 }
 0x161   : > { %v603_v46 = vrot.slane %v592_v45, 4  ;;  %609 = vst.msk [vmem:[#allocation2 + $0x9] sm:$0xf] %vm608_vm8, %v592_v45 }
 0x162   : > { %v575_v47 = vpop.f32.mrf.mxu0 }
 0x163   : > { %610 = vst.msk [vmem:[#allocation2 + $0x11] sm:$0xf] %vm608_vm8, %v603_v46  ;;  %v576_v48 = vadd.f32 %v1434_v40, %v575_v47  ;;  %v1315_v47 = vld [vmem:[%s1912_s3 + $0x80] sm:$0xff] }
 0x164   : > { %1006 = vmatpush.bf16.msrb.mxu1 %v1315_v47 }
 0x165   : > { %v590_v50 = vadd.f32 %v589_v49, %v576_v48 }
 0x167   : > { %v593_v52 = vmax.f32 %v590_v50, 0.0  ;;  %v618_v50 = vld [vmem:[#allocation2 + $0x28] sm:$0x3f] }
 0x168   : > { %v614_v53 = vld [vmem:[#allocation2 + $0x8] sm:$0x3f]  ;;  %v673_v51 = vrot.slane %v618_v50, 4 }
 0x169   : > { %v624_v54 = vrot.slane %v614_v53, 4  ;;  %684 = vst [vmem:[#allocation1 + $0x1] ss:$2 sm:$0xff] %v614_v53  ;;  %v604_v55 = vrot.slane %v593_v52, 4  ;;  %v1196_v62 = vrot.slane %v614_v53, 9  ;;  %v1200_v16 = vrot.slane %v614_v53, 10 }
 0x16a   : > { %v1719_v56 = vld [vmem:[#allocation2 + $0x10] sm:$0x3f]  ;;  %611 = vst.msk [vmem:[#allocation2 + $0x19] sm:$0xf] %vm608_vm8, %v593_v52  ;;  %v676_v57 = vrot.slane %v673_v51, 5 }
 0x16b   : > { %686 = vst [vmem:[#allocation1 + $0x10] ss:$2 sm:$0xff] %v1719_v56  ;;  %v633_v60 = vrot.slane %v624_v54, 5  ;;  %v625_v3 = vrot.slane %v1719_v56, 4  ;;  %v652_v12 = vrot.slane %v624_v54, 6  ;;  %v1197_v14 = vrot.slane %v1719_v56, 9 }
 0x16c   : > { %612 = vst.msk [vmem:[#allocation2 + $0x21] sm:$0xf] %vm608_vm8, %v604_v55  ;;  %v1201_v9 = vrot.slane %v1719_v56, 10  ;;  %v1205_v55 = vrot.slane %v618_v50, 9 }
 0x16d   : > { %v634_v0 = vsel %vm1724_vm11, %v1196_v62, %v633_v60  ;;  %v637_v10 = vrot.slane %v625_v3, 5  ;;  %v653_v20 = vsel %vm1739_vm14, %v1200_v16, %v652_v12  ;;  %v656_v7 = vrot.slane %v625_v3, 6  ;;  %v1314_v12 = vld [vmem:[%s1912_s3 + $0x78] sm:$0xff]  ;;  %v1317_v16 = vld [vmem:[%s1914_s5] sm:$0xff] }
 0x16e   : > { %v1206_v62 = vrot.slane %v618_v50, 10  ;;  %985 = vmatpush.bf16.msra.mxu3 %v1314_v12  ;;  %1043 = vmatpush.bf16.msra.mxu1 %v1317_v16 }
 0x16f   : > { %v638_v19 = vsel %vm1724_vm11, %v1197_v14, %v637_v10  ;;  %v657_v23 = vsel %vm1739_vm14, %v1201_v9, %v656_v7  ;;  %v1300_v10 = vld [vmem:[%s1912_s3 + $0x8] sm:$0xff] }
 0x170   : > { %v1730_v63 = vld.sshfl [vmem:[#allocation1] sm:$0xff pattern:$0x75316420]  ;;  %v1312_v14 = vld [vmem:[%s1912_s3 + $0x68] sm:$0xff] }
 0x171   : > { %693 = vst [vmem:[#allocation1] ss:$2 sm:$0xff] %v630_v61  ;;  %v1734_v1 = vld [vmem:[#allocation2 + $0x18] sm:$0x3f] }
 0x172   : > { %695 = vst [vmem:[#allocation1 + $0x1] ss:$2 sm:$0xff] %v634_v0  ;;  %v626_v2 = vrot.slane %v1734_v1, 4  ;;  %v1198_v13 = vrot.slane %v1734_v1, 9  ;;  %v1202_v22 = vrot.slane %v1734_v1, 10 }
 0x173   : > { %688 = vst [vmem:[#allocation1 + $0x11] ss:$2 sm:$0xff] %v1734_v1  ;;  %v617_v32 = vld [vmem:[#allocation2 + $0x20] sm:$0x3f] }
 0x174   : > { %v641_v8 = vrot.slane %v626_v2, 5  ;;  %v660_v21 = vrot.slane %v626_v2, 6  ;;  %v663_v35 = vrot.slane %v617_v32, 4  ;;  %v1203_v38 = vrot.slane %v617_v32, 9 }
 0x175   : > { %v1204_v45 = vrot.slane %v617_v32, 10 }
 0x176   : > { %v1749_v17 = vsel %vm1724_vm11, %v1198_v13, %v641_v8  ;;  %v1764_v29 = vsel %vm1739_vm14, %v1202_v22, %v660_v21  ;;  %v666_v37 = vrot.slane %v663_v35, 5  ;;  %v670_v43 = vrot.slane %v663_v35, 6  ;;  %v1305_v8 = vld [vmem:[%s1912_s3 + $0x30] sm:$0xff] }
 0x177   : > { %972 = vmatpush.bf16.msra.mxu2 %v1305_v8  ;;  %v1313_v13 = vld [vmem:[%s1912_s3 + $0x70] sm:$0xff] }
 0x178   : > { %v667_v40 = vsel %vm1724_vm11, %v1203_v38, %v666_v37  ;;  %v671_v48 = vsel %vm1739_vm14, %v1204_v45, %v670_v43  ;;  %986 = vmatpush.bf16.msra.mxu3 %v1313_v13  ;;  %v1309_v21 = vld [vmem:[%s1912_s3 + $0x50] sm:$0xff]  ;;  %v1307_v37 = vld [vmem:[%s1912_s3 + $0x40] sm:$0xff] }
 0x179   : > { %v700_v15 = vld.sshfl [vmem:[#allocation1] sm:$0xff pattern:$0x75316420] }
 0x17a   : > { %v1751_v18 = vld.sshfl [vmem:[#allocation1 + $0x10] sm:$0xff pattern:$0x75316420]  ;;  %708 = vst [vmem:[#allocation1] ss:$2 sm:$0xff] %v649_v11  ;;  %v1299_v11 = vld [vmem:[%s1912_s3] sm:$0xff] }
 0x17b   : > { %699 = vst [vmem:[#allocation1 + $0x11] ss:$2 sm:$0xff] %v1749_v17 }
 0x17c   : > { %697 = vst [vmem:[#allocation1 + $0x10] ss:$2 sm:$0xff] %v638_v19  ;;  %987 = vmatpush.bf16.msra.mxu3 %v1312_v14 }
 0x17d   : > { %710 = vst [vmem:[#allocation1 + $0x1] ss:$2 sm:$0xff] %v653_v20 }
 0x183   : > { %v701_v26 = vld.sshfl [vmem:[#allocation1 + $0x10] sm:$0xff pattern:$0x75316420] }
 0x184   : > { %v1404_v30 = vpack.i.bf16 %v701_v26, %v700_v15  ;;  %712 = vst [vmem:[#allocation1 + $0x10] ss:$2 sm:$0xff] %v657_v23  ;;  %v715_v31 = vld.sshfl [vmem:[#allocation1] sm:$0xff pattern:$0x75316420]  ;;  %v1308_v26 = vld [vmem:[%s1912_s3 + $0x48] sm:$0xff] }
 0x185   : > { %714 = vst [vmem:[#allocation1 + $0x11] ss:$2 sm:$0xff] %v1764_v29  ;;  %v1311_v15 = vld [vmem:[%s1912_s3 + $0x60] sm:$0xff] }
 0x186   : > { %1405 = vrot.lane.b32.xlu1 %v1404_v30, %s1501_s15  ;;  %723 = vst [vmem:[#allocation1] ss:$2 sm:$0xff] %v614_v53  ;;  %988 = vmatpush.bf16.msra.mxu3 %v1311_v15 }
 0x187   : > { %725 = vst [vmem:[#allocation1 + $0x1] ss:$2 sm:$0xff] %v1719_v56 }
 0x18c   : > { %v716_v33 = vld.sshfl [vmem:[#allocation1 + $0x10] sm:$0xff pattern:$0x75316420] }
 0x18d   : > { %v1409_v34 = vpack.i.bf16 %v716_v33, %v715_v31  ;;  %727 = vst [vmem:[#allocation1 + $0x10] ss:$2 sm:$0xff] %v1734_v1 }
 0x18e   : > { %729 = vst [vmem:[#allocation1 + $0x11] ss:$2 sm:$0xff] %v617_v32  ;;  %v730_v36 = vld.sshfl [vmem:[#allocation1] sm:$0xff pattern:$0x75316420] }
 0x18f   : > { %1410 = vrot.lane.b32.xlu2 %v1409_v34, %s1503_s19  ;;  %738 = vst [vmem:[#allocation1] ss:$2 sm:$0xff] %v634_v0  ;;  %v680_v0 = vrot.slane %v673_v51, 6 }
 0x190   : > { %740 = vst [vmem:[#allocation1 + $0x1] ss:$2 sm:$0xff] %v638_v19 }
 0x195   : > { %v731_v39 = vld.sshfl [vmem:[#allocation1 + $0x10] sm:$0xff pattern:$0x75316420] }
 0x196   : > { %v1414_v41 = vpack.i.bf16 %v731_v39, %v730_v36  ;;  %742 = vst [vmem:[#allocation1 + $0x10] ss:$2 sm:$0xff] %v1749_v17 }
 0x197   : > { %744 = vst [vmem:[#allocation1 + $0x11] ss:$2 sm:$0xff] %v667_v40  ;;  %v1774_v42 = vld.sshfl [vmem:[#allocation1] sm:$0xff pattern:$0x75316420] }
 0x198   : > { %1415 = vrot.lane.b32.xlu0 %v1414_v41, %s1505_s26  ;;  %749 = vst [vmem:[#allocation1] ss:$2 sm:$0xff] %v653_v20 }
 0x199   : > { %751 = vst [vmem:[#allocation1 + $0x1] ss:$2 sm:$0xff] %v657_v23 }
 0x19e   : > { %v1780_v46 = vld.sshfl [vmem:[#allocation1 + $0x10] sm:$0xff pattern:$0x75316420] }
 0x19f   : > { %753 = vst [vmem:[#allocation1 + $0x10] ss:$2 sm:$0xff] %v1764_v29 }
 0x1a0   : > { %755 = vst [vmem:[#allocation1 + $0x11] ss:$2 sm:$0xff] %v671_v48  ;;  %v756_v49 = vld.sshfl [vmem:[#allocation1] sm:$0xff pattern:$0x75316420] }
 0x1a1   : > { %764 = vst [vmem:[#allocation1] ss:$2 sm:$0xff] %v1719_v56  ;;  %v677_v56 = vsel %vm1724_vm11, %v1205_v55, %v676_v57 }
 0x1a2   : > { %766 = vst [vmem:[#allocation1 + $0x1] ss:$2 sm:$0xff] %v1734_v1  ;;  %v681_v1 = vsel %vm1739_vm14, %v1206_v62, %v680_v0 }
 0x1a7   : > { %v757_v52 = vld.sshfl [vmem:[#allocation1 + $0x10] sm:$0xff pattern:$0x75316420] }
 0x1a8   : > { %v1419_v53 = vpack.i.bf16 %v757_v52, %v756_v49  ;;  %768 = vst [vmem:[#allocation1 + $0x10] ss:$2 sm:$0xff] %v617_v32 }
 0x1a9   : > { %770 = vst [vmem:[#allocation1 + $0x11] ss:$2 sm:$0xff] %v618_v50  ;;  %v771_v54 = vld.sshfl [vmem:[#allocation1] sm:$0xff pattern:$0x75316420] }
 0x1aa   : > { %1420 = vrot.lane.b32.xlu1 %v1419_v53, %s1501_s15  ;;  %779 = vst [vmem:[#allocation1] ss:$2 sm:$0xff] %v638_v19  ;;  %s1450_s15 = sshra.s32 %s1072_s18, 4  ;;  %s1451_s15 = int_to_ptr.hbm [resolvable:$true] %s1450_s15 }
 0x1ab   : > { %781 = vst [vmem:[#allocation1 + $0x1] ss:$2 sm:$0xff] %v1749_v17  ;;  %v1310_v17 = vld [vmem:[%s1912_s3 + $0x58] sm:$0xff]  ;;  %p1457_p0 = scmp.lt.s32.totalorder %s1451_s15, %s1915_s6 }
 0x1ac   : > { %989 = vmatpush.bf16.msra.mxu3 %v1310_v17 }
 0x1b0   : > { %v772_v58 = vld.sshfl [vmem:[#allocation1 + $0x10] sm:$0xff pattern:$0x75316420]  ;;  %990 = vmatpush.bf16.msra.mxu3 %v1309_v21 }
 0x1b1   : > { %v1424_v60 = vpack.i.bf16 %v772_v58, %v771_v54  ;;  %783 = vst [vmem:[#allocation1 + $0x10] ss:$2 sm:$0xff] %v667_v40 }
 0x1b2   : > { %785 = vst [vmem:[#allocation1 + $0x11] ss:$2 sm:$0xff] %v677_v56  ;;  %v786_v61 = vld.sshfl [vmem:[#allocation1] sm:$0xff pattern:$0x75316420] }
 0x1b3   : > { %1425 = vrot.lane.b32.xlu2 %v1424_v60, %s1503_s19  ;;  %794 = vst [vmem:[#allocation1] ss:$2 sm:$0xff] %v657_v23  ;;  %s1452_s19 = scalar_lea.hbm %s1451_s15, 16 }
 0x1b4   : > { %796 = vst [vmem:[#allocation1 + $0x1] ss:$2 sm:$0xff] %v1764_v29  ;;  %991 = vmatpush.bf16.msra.mxu3 %v1308_v26  ;;  %p1453_p11 = scmp.ne.s32.totalorder %s1451_s15, %s1452_s19 }
 0x1b6   : > { %p1454_p12 = pnand %p1453_p11, %p1583_p5 }
 0x1b8   : > { %992 = vmatpush.bf16.msra.mxu3 %v1307_v37  ;;  %p1455_p13 = pneg %p1454_p12 }
 0x1b9   : > { %v787_v2 = vld.sshfl [vmem:[#allocation1 + $0x10] sm:$0xff pattern:$0x75316420] }
 0x1ba   : > { %v1429_v3 = vpack.i.bf16 %v787_v2, %v786_v61  ;;  %798 = vst [vmem:[#allocation1 + $0x10] ss:$2 sm:$0xff] %v671_v48  ;;  %v1435_v61 = vld [vmem:[%s1913_s4] ss:$0 sm:$0xff] }
 0x1bb   : > { %800 = vst [vmem:[#allocation1 + $0x11] ss:$2 sm:$0xff] %v681_v1  ;;  %v801_v59 = vld.sshfl [vmem:[#allocation1] sm:$0xff pattern:$0x75316420] }
 0x1bc   : > { %1430 = vrot.lane.b32.xlu0 %v1429_v3, %s1505_s26  ;;  %1013 = vst [vmem:[#allocation1] ss:$2 sm:$0xff] %v1645_v24  ;;  %v1304_v24 = vld [vmem:[%s1912_s3 + $0x28] sm:$0xff]  ;;  %s1456_s26 = scalar_lea.hbm %s1915_s6, 32 }
 0x1bd   : > { %1015 = vst [vmem:[#allocation1 + $0x1] ss:$2 sm:$0xff] %v1648_v25  ;;  %973 = vmatpush.bf16.msra.mxu2 %v1304_v24  ;;  %v1303_v25 = vld [vmem:[%s1912_s3 + $0x20] sm:$0xff]  ;;  %p1458_p1 = scmp.lt.s32.totalorder %s1456_s26, %s1452_s19 }
 0x1bf   : > { %p1459_p2 = por %p1458_p1, %p1457_p0 }
 0x1c1   : > { %974 = vmatpush.bf16.msra.mxu2 %v1303_v25  ;;  %p1460_p3 = pnand %p1459_p2, %p1455_p13 }
 0x1c2   : > { %v802_v4 = vld.sshfl [vmem:[#allocation1 + $0x10] sm:$0xff pattern:$0x75316420] }
 0x1c3   : > { %v819_v5 = vpack.c.bf16 %v802_v4, %v801_v59  ;;  %1017 = vst [vmem:[#allocation1 + $0x10] ss:$2 sm:$0xff] %v1651_v27  ;;  %v1302_v27 = vld [vmem:[%s1912_s3 + $0x18] sm:$0xff] }
 0x1c4   : > { %1019 = vst [vmem:[#allocation1 + $0x11] ss:$2 sm:$0xff] %v1654_v28  ;;  %v1301_v28 = vld [vmem:[%s1912_s3 + $0x10] sm:$0xff]  ;;  %v1020_v38 = vld.sshfl [vmem:[#allocation1] sm:$0xff pattern:$0x75316420] }
 0x1c5   : > { %1279 = vmatmul.msk.bf16.vlgmr.msrb.gmra.mxu1 %vm465_vm1, %v819_v5  ;;  %975 = vmatpush.bf16.msra.mxu2 %v1302_v27 }
 0x1c9   : > { %976 = vmatpush.bf16.msra.mxu2 %v1301_v28 }
 0x1cb   : > { %v1021_v39 = vld.sshfl [vmem:[#allocation1 + $0x10] sm:$0xff pattern:$0x75316420] }
 0x1cc   : > { %v1024_v40 = vpack.c.bf16 %v1021_v39, %v1020_v38 }
 0x1cd   : > { %977 = vmatpush.bf16.msra.mxu2 %v1300_v10 }
 0x1d1   : > { %978 = vmatpush.bf16.msra.mxu2 %v1299_v11 }
 0x1d5   : > { %1284 = vmatmul.msk.bf16.vlgmr.msra.gmra.mxu1 %vm462_vm0, %v1024_v40 }
 0x1e9   : > { %v1411_v9 = vpop.permute.xlu2 %1410 }
 0x1ea   : > { %v1413_v29 = vunpack.i.h.bf16 %v1411_v9  ;;  %v1412_v30 = vunpack.i.l.bf16 %v1411_v9 }
 0x1f8   : > { %v1406_v19 = vpop.permute.xlu1 %1405 }
 0x1f9   : > { %v1408_v20 = vunpack.i.h.bf16 %v1406_v19  ;;  %v1407_v7 = vunpack.i.l.bf16 %v1406_v19 }
 0x1fb   : > { %v806_v22 = vsel %vm465_vm1, %v1751_v18, %v1408_v20  ;;  %v805_v23 = vsel %vm465_vm1, %v1730_v63, %v1407_v7 }
 0x1fc   : > { %v807_v34 = vsel %vm471_vm3, %v805_v23, %v1412_v30  ;;  %v808_v35 = vsel %vm471_vm3, %v806_v22, %v1413_v29 }
 0x20a   : > { %v1416_v31 = vpop.permute.xlu0 %1415 }
 0x20b   : > { %v1418_v32 = vunpack.i.h.bf16 %v1416_v31  ;;  %v1417_v33 = vunpack.i.l.bf16 %v1416_v31 }
 0x20d   : > { %v809_v36 = vsel %vm477_vm5, %v807_v34, %v1417_v33  ;;  %v810_v18 = vsel %vm477_vm5, %v808_v35, %v1418_v32  ;;  %v1426_v45 = vpop.permute.xlu2 %1425 }
 0x20e   : > { %v817_v63 = vpack.c.bf16 %v810_v18, %v809_v36  ;;  %v1428_v49 = vunpack.i.h.bf16 %v1426_v45  ;;  %v1427_v50 = vunpack.i.l.bf16 %v1426_v45 }
 0x210   : > { %979 = vmatmul.bf16.vlgmr.msra.gmra.mxu2 %v817_v63 }
 0x21c   : > { %v1421_v41 = vpop.permute.xlu1 %1420 }
 0x21d   : > { %v1423_v43 = vunpack.i.h.bf16 %v1421_v41  ;;  %v1422_v44 = vunpack.i.l.bf16 %v1421_v41 }
 0x21f   : > { %v812_v47 = vsel %vm465_vm1, %v1780_v46, %v1423_v43  ;;  %v811_v48 = vsel %vm465_vm1, %v1774_v42, %v1422_v44 }
 0x220   : > { %v813_v54 = vsel %vm471_vm3, %v811_v48, %v1427_v50  ;;  %v814_v55 = vsel %vm471_vm3, %v812_v47, %v1428_v49 }
 0x22e   : > { %v1431_v51 = vpop.permute.xlu0 %1430 }
 0x22f   : > { %v1433_v52 = vunpack.i.h.bf16 %v1431_v51  ;;  %v1432_v53 = vunpack.i.l.bf16 %v1431_v51 }
 0x231   : > { %v815_v57 = vsel %vm477_vm5, %v813_v54, %v1432_v53  ;;  %v816_v56 = vsel %vm477_vm5, %v814_v55, %v1433_v52 }
 0x232   : > { %v818_v58 = vpack.c.bf16 %v816_v56, %v815_v57 }
 0x234   : > { %993 = vmatmul.bf16.vlgmr.msra.gmra.mxu3 %v818_v58 }
 0x242   : > { %v1008_v46 = vpop.f32.mrf.mxu1 }
 0x24a   : > { %v1010_v60 = vpop.f32.mrf.mxu1 }
 0x252   : > { %v1045_v2 = vpop.f32.mrf.mxu1 }
 0x25a   : > { %v1047_v27 = vpop.f32.mrf.mxu1 }
 0x293   : > { %v980_v42 = vpop.f32.mrf.mxu2 }
 0x294   : > { %v981_v62 = vadd.f32 %v1435_v61, %v980_v42 }
 0x29b   : > { %v982_v59 = vpop.f32.mrf.mxu2 }
 0x29c   : > { %v983_v5 = vadd.f32 %v1435_v61, %v982_v59 }
 0x2b7   : > { %v994_v0 = vpop.f32.mrf.mxu3 }
 0x2b8   : > { %v995_v1 = vadd.f32 %v994_v0, %v981_v62 }
 0x2ba   : > { %v1009_v3 = vadd.f32 %v1008_v46, %v995_v1 }
 0x2bc   : > { %v1050_v4 = vadd.f32 %v1045_v2, %v1009_v3 }
 0x2be   : > { %v1052_v6 = vmax.f32 %v1050_v4, 0.0 }
 0x2bf   : > { %v996_v8 = vpop.f32.mrf.mxu3 }
 0x2c0   : > { %1054 = vst.msk [vmem:[%s244_s16] sm:$0xff] %vm465_vm1, %v1052_v6  ;;  %v997_v24 = vadd.f32 %v996_v8, %v983_v5 }
 0x2c2   : > { %v1011_v25 = vadd.f32 %v1010_v60, %v997_v24 }
 0x2c4   : > { %v1051_v28 = vadd.f32 %v1047_v27, %v1011_v25 }
 0x2c6   : > { %v1053_v10 = vmax.f32 %v1051_v28, 0.0 }
 0x2c8   : > { %1055 = vst.msk [vmem:[%s244_s16 + $0x8] sm:$0xff] %vm465_vm1, %v1053_v10 }
 0x2c9   : > { %1463 = shalt.err (!%p1460_p3)
}
 0x2ca   : > { %s1508_s9 = smov 128   ;;  %s1509_s11 = smov 8  }
 0x2cb   : > { %1320 = dma.vmem_to_hbm [thread:$0]  (%p1583_p5), %s1070_s17, 256, %s1072_s18, %s1057_s25, %s1508_s9, %s1508_s9, %s1509_s11  }
 0x2cc PF: > { %p1326_p4 = scmp.ge.s32.totalorder %s1498_s24, 2  ;;  %s1086_s12 = sand.u32 1, %s1486_s21  }
 0x2cd   : > { %s1087_s13 = scalar_lea.sflag [#allocation4], %s1086_s12 }
 0x2ce   : > { %p1323_p7 = pnand %p1326_p4, %p1587_p6 }
 0x2d0   : > { %p1324_p8 = pneg %p1323_p7 }
 0x2d2   : > { %1481 = dma.done.wait (%p1324_p8), %s1087_s13, 256  }
 0x2d3   : > { %1483 = vsyncadd (%p1324_p8), %s1087_s13, 4294967040  ;;  %p16_p9 = scmp.ge.s32.totalorder %s1570_s27, 4   ;;  %s1922_s21 = smov %s1490_s22 }
 0x2d4   : > { %s1923_s22 = smov %s1494_s23  ;;  %s1924_s23 = smov %s1581_s30 }
 0x2d5   : > { %s1925_s24 = smov %s1570_s27  ;;  %18 = sbr.rel (!%p16_p9) target bundleno = 3 (0x3), region = 137 }
 0x2da   :  { %1093 = vsyncpa [#allocation4], 1 }
 0x2db   :  { %1095 = vsyncpa [#allocation4 + $0x1], 1 }

</bundles_post_ra>
